<compile_context>
chip_gen: v5e
topology: v5e:2x2
jax: 0.10.0
libtpu: 0.0.40
codegen_flags: <defaults>
</compile_context>

<pallas_src>
import functools

import jax
import jax.numpy as jnp
import numpy as np
from jax import lax
from jax.experimental import pallas as pl
from jax.experimental.pallas import tpu as pltpu

_LANE = 128
_SUBLANE = 8


def _round_up(a, b):
    return -(-a // b) * b


def _chip_info():
    """Returns (vmem_capacity_bytes, has_two_tensorcores) with safe fallbacks."""
    kind = ""
    try:
        kind = jax.devices()[0].device_kind.lower()
    except Exception:
        pass
    multi_tc = "v7" in kind            # v7x: 2 TensorCores per chip
    vmem_cap = None
    try:
        vmem_cap = getattr(pltpu.get_tpu_info(), "vmem_capacity_bytes", None)
    except Exception:
        vmem_cap = None
    if vmem_cap is None:
        vmem_cap = (64 if multi_tc else 128) * 1024 * 1024
    return int(vmem_cap), multi_tc


def _sparse_gate_kernel(x_ref, w_ref, noise_ref, out_ref, acc_ref, *,
                        k, n_experts, e_pad, compute_dtype):
    kf = pl.program_id(1)

    @pl.when(kf == 0)
    def _():
        acc_ref[...] = jnp.zeros_like(acc_ref)

    # Single fused MXU matmul per (batch, feature) tile; contract the feature
    # axis of BOTH operands (W @ x^T pattern) so the partial logits come out
    # LANE-DENSE: (2*Ep, TB) with batch on the 128-lane axis.
    xb = x_ref[...].astype(compute_dtype)          # VPU cast on the VMEM tile
    acc_ref[...] += lax.dot_general(
        w_ref[...], xb, dimension_numbers=(((1,), (1,)), ((), ())),
        preferred_element_type=jnp.float32)        # (2*Ep, TB) f32 accumulate

    @pl.when(kf == pl.num_programs(1) - 1)
    def _():
        logits = acc_ref[...]                      # (2*Ep, TB)
        gate_logits = logits[:e_pad, :]            # (Ep, TB)
        noise_logits = logits[e_pad:, :]           # (Ep, TB)
        noise_t = noise_ref[...]                   # (Ep, TB) f32

        # numerically-stable softplus: max(z,0) + log1p(exp(-|z|))
        sp = jnp.maximum(noise_logits, 0.0) + jnp.log1p(jnp.exp(-jnp.abs(noise_logits)))
        ew = gate_logits + noise_t * sp            # (Ep, TB)

        row = lax.broadcasted_iota(jnp.int32, ew.shape, 0)   # expert index
        neg_inf = jnp.float32(-jnp.inf)
        if e_pad > n_experts:
            # padded expert rows must never win the top-k
            ew = jnp.where(row < n_experts, ew, neg_inf)

        # Fused iterative top-k + softmax-scatter over the small sublane axis:
        # per step accumulate res_unnorm += onehot * exp(m - v_max) and
        # denom += exp(m - v_max); keeps live state at ~3 arrays for any k.
        work = ew
        v_max = jnp.max(work, axis=0, keepdims=True)          # (1, TB)
        res_un = jnp.zeros(ew.shape, jnp.float32)
        denom = jnp.zeros((1, ew.shape[1]), jnp.float32)
        for j in range(k):
            m = v_max if j == 0 else jnp.max(work, axis=0, keepdims=True)
            is_max = work == m
            # first-occurrence index on ties (matches lax.top_k / torch.topk)
            idx = jnp.min(jnp.where(is_max, row, e_pad), axis=0, keepdims=True)
            onehot = (row == idx).astype(jnp.float32)          # (Ep, TB)
            e = jnp.exp(m - v_max)                             # (1, TB)
            res_un = res_un + onehot * e
            denom = denom + e
            work = jnp.where(onehot > 0, neg_inf, work)

        # exact division: denom is only a (1, TB) vector, cost is negligible
        out_ref[...] = (res_un * (1.0 / denom)).astype(out_ref.dtype)


def sparse_gate(x, gate_weights, noise_weights, noise, *, k=2,
                tile_b=512, compute_dtype=None, vmem_budget_bytes=None):
    """x: (B, F); gate/noise_weights: (E, F); noise: (B, E)  ->  (B, E)."""
    B, F = x.shape
    E = gate_weights.shape[0]
    assert noise_weights.shape == (E, F) and noise.shape == (B, E)
    assert 1 <= k <= E, "need 1 <= k <= n_experts (k > E would softmax over -inf)"

    # MXU compute dtype. Default: x's own dtype -> no cast, no extra HBM pass.
    # Pass jnp.bfloat16 (or hand x in already as bf16) for the bandwidth win.
    compute_dtype = np.dtype(x.dtype if compute_dtype is None else compute_dtype)

    e_pad = _round_up(E, _SUBLANE)
    x_isz = np.dtype(x.dtype).itemsize
    w_isz = compute_dtype.itemsize

    vmem_cap, multi_tc = _chip_info()
    if vmem_budget_bytes is None:
        vmem_budget_bytes = (vmem_cap * 3) // 4     # ~96 MiB v5e/v6e, ~48 MiB v7x

    # ---- tile sizing -------------------------------------------------------
    tile_b = min(_round_up(tile_b, _LANE), _round_up(B, _LANE))

    # Contraction (F) tile candidates: must divide F exactly (a ragged F tile
    # would fold unspecified pad values into the accumulation).
    f_cands = [F] + [t for t in (4096, 2048, 1024, 512) if t < F and F % t == 0]

    def w_bufs(tf):
        return 1 if tf == F else 2   # full-F weights are constant -> Buffered(1)

    def vmem_est(tb, tf):
        cast_tmp = tb * tf * w_isz if compute_dtype != x.dtype else 0
        return (2 * tb * tf * x_isz                    # x tile (double-buffered)
                + w_bufs(tf) * 2 * e_pad * tf * w_isz  # fused weights
                + 2 * e_pad * tb * 4                   # noise^T tile
                + 2 * e_pad * tb * 4                   # output tile
                + 2 * e_pad * tb * 4                   # f32 accumulator scratch
                + 8 * e_pad * tb * 4                   # epilogue f32 temporaries
                + cast_tmp
                + (2 << 20))                           # slack

    fi = 0
    tile_f = f_cands[fi]
    while vmem_est(tile_b, tile_f) > vmem_budget_bytes:
        if fi + 1 < len(f_cands):          # prefer shrinking F (keeps tile_b=512)
            fi += 1
            tile_f = f_cands[fi]
        elif tile_b > _LANE:
            tile_b = _round_up(tile_b // 2, _LANE)
        else:
            break
    grid_b = pl.cdiv(B, tile_b)
    # Only split small batches into >=2 grid steps on 2-TensorCore chips (v7x).
    if multi_tc and grid_b < 2 and tile_b > _LANE:
        tile_b = _round_up(tile_b // 2, _LANE)
        grid_b = pl.cdiv(B, tile_b)
    grid_f = F // tile_f

    # ---- tiny operand prep (no copy / pad of the large x operand) ----------
    w_fused = jnp.zeros((2 * e_pad, F), compute_dtype)
    w_fused = w_fused.at[:E].set(gate_weights.astype(compute_dtype))
    w_fused = w_fused.at[e_pad:e_pad + E].set(noise_weights.astype(compute_dtype))
    noise_t = noise.astype(jnp.float32).T          # (E, B): tiny transpose

    if grid_f == 1:
        w_spec = pl.BlockSpec((2 * e_pad, tile_f), lambda i, kf: (0, kf),
                              pipeline_mode=pl.Buffered(1))
    else:
        w_spec = pl.BlockSpec((2 * e_pad, tile_f), lambda i, kf: (0, kf))

    est = vmem_est(tile_b, tile_f)
    vmem_limit = int(min(vmem_cap - (4 << 20), max(vmem_budget_bytes, est)))

    kernel = functools.partial(_sparse_gate_kernel, k=k, n_experts=E,
                               e_pad=e_pad, compute_dtype=compute_dtype)
    # NOTE: x could take pl.Buffered(3) if xprof ever shows exposed DMA at
    # step boundaries; left at the default double-buffering here.
    out_t = pl.pallas_call(
        kernel,
        out_shape=jax.ShapeDtypeStruct((E, B), jnp.float32),
        grid_spec=pltpu.PrefetchScalarGridSpec(
            num_scalar_prefetch=0,
            grid=(grid_b, grid_f),
            in_specs=[
                pl.BlockSpec((tile_b, tile_f), lambda i, kf: (i, kf)),   # x
                w_spec,                                                  # fused W
                pl.BlockSpec((e_pad, tile_b), lambda i, kf: (0, i)),     # noise^T
            ],
            out_specs=pl.BlockSpec((e_pad, tile_b), lambda i, kf: (0, i)),
            scratch_shapes=[pltpu.VMEM((2 * e_pad, tile_b), jnp.float32)],
        ),
        compiler_params=pltpu.CompilerParams(
            dimension_semantics=("parallel", "arbitrary"),
            vmem_limit_bytes=vmem_limit,
        ),
    )(x, w_fused, noise_t)

    return out_t.T                                  # back to (B, E)


def sparse_gate_ref(x, gate_weights, noise_weights, noise, *, k=2):
    """Pure-JAX reference mirroring the PyTorch forward."""
    gate_logits = x @ gate_weights.T
    noise_logits = x @ noise_weights.T
    expert_w = gate_logits + noise * jax.nn.softplus(noise_logits)
    top_vals, top_idx = lax.top_k(expert_w, k)
    sm = jax.nn.softmax(top_vals, axis=1)
    res = jnp.zeros_like(expert_w)
    b_idx = jnp.arange(x.shape[0])[:, None]
    return res.at[b_idx, top_idx].set(sm)


if __name__ == "__main__":
    B, F, E, K = 8, 32, 8, 2

    key = jax.random.PRNGKey(0)
    kx, kg, kn, knoise = jax.random.split(key, 4)
    x = jax.random.normal(kx, (B, F), dtype=jnp.float32)
    gate_w = 0.1 * jax.random.normal(kg, (E, F), dtype=jnp.float32)
    noise_w = 0.1 * jax.random.normal(kn, (E, F), dtype=jnp.float32)
    # x.new_empty(...).normal_()  ->  standard-normal noise, generated here.
    noise = jax.random.normal(knoise, (B, E), dtype=jnp.float32)

    out = sparse_gate(x, gate_w, noise_w, noise, k=K)
    out = jax.block_until_ready(out)

    ref = sparse_gate_ref(x, gate_w, noise_w, noise, k=K)
    # exact sparsity pattern (same experts selected) + values within tolerance
    # (tolerance covers MXU f32 matmul rounding differences vs the XLA ref)
    np.testing.assert_array_equal(np.asarray(out) != 0, np.asarray(ref) != 0)
    np.testing.assert_allclose(np.asarray(out), np.asarray(ref),
                               rtol=2e-3, atol=2e-3)
    print("KERNEL_OK")
</pallas_src>

<mosaic_0001>
module attributes {stable_mosaic.version = 11 : i64} {
  func.func @_sparse_gate_kernel(%arg0: i32, %arg1: i32, %arg2: memref<128x32xf32, #tpu.memory_space<vmem>>, %arg3: memref<16x32xf32, #tpu.memory_space<vmem>>, %arg4: memref<8x128xf32, #tpu.memory_space<vmem>>, %arg5: memref<8x128xf32, #tpu.memory_space<vmem>>, %arg6: memref<16x128xf32, #tpu.memory_space<vmem>>) attributes {dimension_semantics = [#tpu.dimension_semantics<parallel>, #tpu.dimension_semantics<arbitrary>], iteration_bounds = array<i64: 1, 1>, scalar_prefetch = 0 : i64, scratch_operands = 1 : i64, tpu.core_type = #tpu.core_type<tc>, window_params = [{transform_indices = @transform_0, window_bounds = array<i64: 128, 32>}, {pipeline_mode = #tpu.pipeline_mode<synchronous>, transform_indices = @transform_1, window_bounds = array<i64: 16, 32>}, {transform_indices = @transform_2, window_bounds = array<i64: 8, 128>}, {transform_indices = @transform_3, window_bounds = array<i64: 8, 128>}]} {
    %c0_i32 = arith.constant 0 : i32
    %0 = arith.cmpi eq, %arg1, %c0_i32 : i32
    %1 = arith.extui %0 : i1 to i32
    %c0_i32_0 = arith.constant 0 : i32
    %2 = arith.cmpi ne, %1, %c0_i32_0 : i32
    scf.if %2 {
      %cst_10 = arith.constant 0.000000e+00 : f32
      %12 = vector.broadcast %cst_10 : f32 to vector<16x128xf32>
      %c0_11 = arith.constant 0 : index
      %c0_12 = arith.constant 0 : index
      %13 = vector.load %arg6[%c0_11, %c0_12] : memref<16x128xf32, #tpu.memory_space<vmem>>, vector<16x128xf32>
      tpu.vector_store %arg6[%c0_11, %c0_12], %12 {strides = array<i32>} : memref<16x128xf32, #tpu.memory_space<vmem>>, vector<16x128xf32>,
    } else {
    }
    %c0 = arith.constant 0 : index
    %c0_1 = arith.constant 0 : index
    %3 = vector.load %arg2[%c0, %c0_1] : memref<128x32xf32, #tpu.memory_space<vmem>>, vector<128x32xf32>
    %c0_2 = arith.constant 0 : index
    %c0_3 = arith.constant 0 : index
    %4 = vector.load %arg6[%c0_2, %c0_3] : memref<16x128xf32, #tpu.memory_space<vmem>>, vector<16x128xf32>
    %c0_4 = arith.constant 0 : index
    %c0_5 = arith.constant 0 : index
    %5 = vector.load %arg3[%c0_4, %c0_5] : memref<16x32xf32, #tpu.memory_space<vmem>>, vector<16x32xf32>
    %cst = arith.constant dense<0.000000e+00> : vector<16x128xf32>
    %6 = tpu.matmul %5, %3, %cst {dimension_numbers = #tpu.dot_dimension_numbers<[1], [1], [0], [0], [0, 0, 1, 0], [], []>} : vector<16x32xf32>, vector<128x32xf32>, vector<16x128xf32> -> vector<16x128xf32>
    %7 = arith.addf %4, %6 : vector<16x128xf32>
    %c0_6 = arith.constant 0 : index
    %c0_7 = arith.constant 0 : index
    %8 = vector.load %arg6[%c0_6, %c0_7] : memref<16x128xf32, #tpu.memory_space<vmem>>, vector<16x128xf32>
    tpu.vector_store %arg6[%c0_6, %c0_7], %7 {strides = array<i32>} : memref<16x128xf32, #tpu.memory_space<vmem>>, vector<16x128xf32>,
    %c0_i32_8 = arith.constant 0 : i32
    %9 = arith.cmpi eq, %arg1, %c0_i32_8 : i32
    %10 = arith.extui %9 : i1 to i32
    %c0_i32_9 = arith.constant 0 : i32
    %11 = arith.cmpi ne, %10, %c0_i32_9 : i32
    scf.if %11 {
      %c0_10 = arith.constant 0 : index
      %c0_11 = arith.constant 0 : index
      %12 = vector.load %arg6[%c0_10, %c0_11] : memref<16x128xf32, #tpu.memory_space<vmem>>, vector<16x128xf32>
      %13 = vector.extract_strided_slice %12 {offsets = [0, 0], sizes = [8, 128], strides = [1, 1]} : vector<16x128xf32> to vector<8x128xf32>
      %14 = vector.extract_strided_slice %12 {offsets = [8, 0], sizes = [8, 128], strides = [1, 1]} : vector<16x128xf32> to vector<8x128xf32>
      %c0_12 = arith.constant 0 : index
      %c0_13 = arith.constant 0 : index
      %15 = vector.load %arg4[%c0_12, %c0_13] : memref<8x128xf32, #tpu.memory_space<vmem>>, vector<8x128xf32>
      %cst_14 = arith.constant 0.000000e+00 : f32
      %16 = vector.broadcast %cst_14 : f32 to vector<8x128xf32>
      %17 = arith.maximumf %14, %16 : vector<8x128xf32>
      %18 = math.absf %14 : vector<8x128xf32>
      %cst_15 = arith.constant 0.000000e+00 : f32
      %19 = vector.broadcast %cst_15 : f32 to vector<8x128xf32>
      %20 = arith.subf %19, %18 : vector<8x128xf32>
      %21 = math.exp %20 : vector<8x128xf32>
      %22 = math.log1p %21 : vector<8x128xf32>
      %23 = arith.addf %17, %22 : vector<8x128xf32>
      %24 = arith.mulf %15, %23 : vector<8x128xf32>
      %25 = arith.addf %13, %24 : vector<8x128xf32>
      %26 = tpu.iota {dimensions = array<i32: 0>} : vector<8x128xi32>
      %cst_16 = arith.constant dense<0xFF800000> : vector<128xf32>
      %27 = vector.multi_reduction <maximumf>, %25, %cst_16 [0] : vector<8x128xf32> to vector<128xf32>
      %28 = vector.shape_cast %27 : vector<128xf32> to vector<1x128xf32>
      %cst_17 = arith.constant 0.000000e+00 : f32
      %29 = vector.broadcast %cst_17 : f32 to vector<8x128xf32>
      %cst_18 = arith.constant 0.000000e+00 : f32
      %30 = vector.broadcast %cst_18 : f32 to vector<1x128xf32>
      %31 = vector.broadcast %28 : vector<1x128xf32> to vector<8x128xf32>
      %32 = arith.cmpf oeq, %25, %31 : vector<8x128xf32>
      %c8_i32 = arith.constant 8 : i32
      %33 = vector.broadcast %c8_i32 : i32 to vector<8x128xi32>
      %34 = arith.select %32, %26, %33 : vector<8x128xi1>, vector<8x128xi32>
      %cst_19 = arith.constant dense<2147483647> : vector<128xi32>
      %35 = vector.multi_reduction <minsi>, %34, %cst_19 [0] : vector<8x128xi32> to vector<128xi32>
      %36 = vector.shape_cast %35 : vector<128xi32> to vector<1x128xi32>
      %37 = vector.broadcast %36 : vector<1x128xi32> to vector<8x128xi32>
      %38 = arith.cmpi eq, %26, %37 : vector<8x128xi32>
      %39 = arith.extui %38 : vector<8x128xi1> to vector<8x128xi32>
      %40 = arith.sitofp %39 : vector<8x128xi32> to vector<8x128xf32>
      %41 = arith.subf %28, %28 : vector<1x128xf32>
      %42 = math.exp %41 : vector<1x128xf32>
      %43 = vector.broadcast %42 : vector<1x128xf32> to vector<8x128xf32>
      %44 = arith.mulf %40, %43 : vector<8x128xf32>
      %45 = arith.addf %29, %44 : vector<8x128xf32>
      %46 = arith.addf %30, %42 : vector<1x128xf32>
      %cst_20 = arith.constant 0.000000e+00 : f32
      %47 = vector.broadcast %cst_20 : f32 to vector<8x128xf32>
      %48 = arith.cmpf ogt, %40, %47 : vector<8x128xf32>
      %cst_21 = arith.constant 0xFF800000 : f32
      %49 = vector.broadcast %cst_21 : f32 to vector<8x128xf32>
      %50 = arith.select %48, %49, %25 : vector<8x128xi1>, vector<8x128xf32>
      %cst_22 = arith.constant dense<0xFF800000> : vector<128xf32>
      %51 = vector.multi_reduction <maximumf>, %50, %cst_22 [0] : vector<8x128xf32> to vector<128xf32>
      %52 = vector.shape_cast %51 : vector<128xf32> to vector<1x128xf32>
      %53 = vector.broadcast %52 : vector<1x128xf32> to vector<8x128xf32>
      %54 = arith.cmpf oeq, %50, %53 : vector<8x128xf32>
      %c8_i32_23 = arith.constant 8 : i32
      %55 = vector.broadcast %c8_i32_23 : i32 to vector<8x128xi32>
      %56 = arith.select %54, %26, %55 : vector<8x128xi1>, vector<8x128xi32>
      %cst_24 = arith.constant dense<2147483647> : vector<128xi32>
      %57 = vector.multi_reduction <minsi>, %56, %cst_24 [0] : vector<8x128xi32> to vector<128xi32>
      %58 = vector.shape_cast %57 : vector<128xi32> to vector<1x128xi32>
      %59 = vector.broadcast %58 : vector<1x128xi32> to vector<8x128xi32>
      %60 = arith.cmpi eq, %26, %59 : vector<8x128xi32>
      %61 = arith.extui %60 : vector<8x128xi1> to vector<8x128xi32>
      %62 = arith.sitofp %61 : vector<8x128xi32> to vector<8x128xf32>
      %63 = arith.subf %52, %28 : vector<1x128xf32>
      %64 = math.exp %63 : vector<1x128xf32>
      %65 = vector.broadcast %64 : vector<1x128xf32> to vector<8x128xf32>
      %66 = arith.mulf %62, %65 : vector<8x128xf32>
      %67 = arith.addf %45, %66 : vector<8x128xf32>
      %68 = arith.addf %46, %64 : vector<1x128xf32>
      %cst_25 = arith.constant 1.000000e+00 : f32
      %69 = vector.broadcast %cst_25 : f32 to vector<1x128xf32>
      %70 = arith.divf %69, %68 : vector<1x128xf32>
      %71 = vector.broadcast %70 : vector<1x128xf32> to vector<8x128xf32>
      %72 = arith.mulf %67, %71 : vector<8x128xf32>
      %c0_26 = arith.constant 0 : index
      %c0_27 = arith.constant 0 : index
      %73 = vector.load %arg5[%c0_26, %c0_27] : memref<8x128xf32, #tpu.memory_space<vmem>>, vector<8x128xf32>
      tpu.vector_store %arg5[%c0_26, %c0_27], %72 {strides = array<i32>} : memref<8x128xf32, #tpu.memory_space<vmem>>, vector<8x128xf32>,
    } else {
    }
    return
  }
  func.func @transform_0(%arg0: i32, %arg1: i32) -> (i32, i32) {
    %c0_i32 = arith.constant 0 : i32
    return %arg0, %arg1 : i32, i32
  }
  func.func @transform_1(%arg0: i32, %arg1: i32) -> (i32, i32) {
    %c0_i32 = arith.constant 0 : i32
    %c0_i32_0 = arith.constant 0 : i32
    return %c0_i32, %arg1 : i32, i32
  }
  func.func @transform_2(%arg0: i32, %arg1: i32) -> (i32, i32) {
    %c0_i32 = arith.constant 0 : i32
    %c0_i32_0 = arith.constant 0 : i32
    return %c0_i32, %arg0 : i32, i32
  }
  func.func @transform_3(%arg0: i32, %arg1: i32) -> (i32, i32) {
    %c0_i32 = arith.constant 0 : i32
    %c0_i32_0 = arith.constant 0 : i32
    return %c0_i32, %arg0 : i32, i32
  }
}

</mosaic_0001>

<bundles_post_ra>
// kernel: tpu_custom_call.1
= control target key start
LH: loop header
LB: loop body
LE: loop exit
PB: predicated region body
PF: predicated region fallthrough
CT: control target
= control target key end

     0   :  { %8 = vsyncpa [#allocation4], 0  ;;  %s510_s0 = inlined_call_operand.hbm [shape: f32[8,32], index: 0, kind: input, shape index: {}]   ;;  %s511_s1 = inlined_call_operand.hbm [shape: f32[16,32], index: 1, kind: input, shape index: {}]   ;;  %s512_s2 = inlined_call_operand.hbm [shape: f32[8,8], index: 2, kind: input, shape index: {}]   ;;  %s513_s3 = inlined_call_operand.hbm [shape: f32[8,8], index: 3, kind: output, shape index: {}]  }
   0x1   :  { %9 = vsyncpa [#allocation7], 0 }
   0x2   :  { %10 = vsyncpa [#allocation5], 0 }
   0x3   :  { %14 = vsyncadd [#allocation4], 1920  ;;  %s28_s14 = sshll.u32 %s511_s1, 4  ;;  %s437_s15 = smov [#allocation6]   ;;  %s29_s14 = int_to_ptr.hbm [resolvable:$true] %s28_s14 }
   0x4   :  { %s30_s16 = sshll.u32 %s437_s15, 4  ;;  %s15_s19 = sshll.u32 %s510_s0, 4  ;;  %s31_s16 = int_to_ptr.vmem [resolvable:$true] %s30_s16  ;;  %s16_s19 = int_to_ptr.hbm [resolvable:$true] %s15_s19 }
   0x5   :  { %s438_s20 = smov 128   ;;  %s439_s21 = smov 8  }
   0x6   :  { %36 = dma.hbm_to_vmem [thread:$0]  %s29_s14, 256, %s31_s16, [#allocation7], %s438_s20, %s438_s20, %s439_s21  }
   0x7   :  { %s440_s22 = smov [#allocation3]   ;;  %s42_s26 = sshll.u32 %s512_s2, 4  ;;  %s43_s26 = int_to_ptr.hbm [resolvable:$true] %s42_s26 }
   0x8   :  { %s17_s23 = sshll.u32 %s440_s22, 4  ;;  %s441_s1 = smov [#allocation8]   ;;  %s18_s23 = int_to_ptr.vmem [resolvable:$true] %s17_s23 }
   0x9   :  { %23 = dma.hbm_to_vmem [thread:$0]  %s16_s19, 128, %s18_s23, [#allocation4], %s438_s20, %s438_s20, %s439_s21  }
   0xa   :  { %s44_s27 = sshll.u32 %s441_s1, 4  ;;  %s45_s27 = int_to_ptr.vmem [resolvable:$true] %s44_s27 }
   0xb   :  { %47 = dma.hbm_to_vmem [thread:$0]  %s43_s26, 128, %s45_s27, [#allocation7]  }
   0xc   :  { %431 = dma.done.wait [#allocation4], 2048  }
   0xd   :  { %432 = vsyncadd [#allocation4], 4294965248 }
   0xe   :  { %433 = dma.done.wait [#allocation7], 384  }
   0xf   :  { %434 = vsyncadd [#allocation7], 4294966912  ;;  %vm86_vm0 = vcmask 261120   ;;  %v81_v0 = vld [vmem:[#allocation3 + $0x78] sm:$0xff]  ;;  %v80_v1 = vld [vmem:[#allocation3 + $0x70] sm:$0xff]  ;;  %v191_v40 = vlaneseq  ;;  %v442_v52 = vmov 0.0  }
  0x10   :  { %302 = vmatpush.xpose.msk.msra.mxu1 %vm86_vm0, %v81_v0  ;;  %282 = vmatpush.xpose.msk.msra.mxu0 %vm86_vm0, %v81_v0  ;;  %v79_v2 = vld [vmem:[#allocation3 + $0x68] sm:$0xff]  ;;  %v78_v3 = vld [vmem:[#allocation3 + $0x60] sm:$0xff]  ;;  %v77_v4 = vld [vmem:[#allocation3 + $0x58] sm:$0xff]  ;;  %s443_s0 = smov [#allocation9]   ;;  %s271_s30 = sshll.u32 %s513_s3, 4  ;;  %s272_s30 = int_to_ptr.hbm [resolvable:$true] %s271_s30 }
  0x11   :  { %v76_v5 = vld [vmem:[#allocation3 + $0x50] sm:$0xff]  ;;  %v75_v6 = vld [vmem:[#allocation3 + $0x48] sm:$0xff]  ;;  %v74_v7 = vld [vmem:[#allocation3 + $0x40] sm:$0xff]  ;;  %v192_v43 = vshrl.u32 %v191_v40, 7  ;;  %s269_s2 = sshll.u32 %s443_s0, 4  ;;  %s270_s2 = int_to_ptr.vmem [resolvable:$true] %s269_s2 }
  0x12   :  { %v73_v8 = vld [vmem:[#allocation3 + $0x38] sm:$0xff]  ;;  %v72_v9 = vld [vmem:[#allocation3 + $0x30] sm:$0xff]  ;;  %v71_v10 = vld [vmem:[#allocation3 + $0x28] sm:$0xff] }
  0x13   :  { %v70_v11 = vld [vmem:[#allocation3 + $0x20] sm:$0xff]  ;;  %v69_v12 = vld [vmem:[#allocation3 + $0x18] sm:$0xff]  ;;  %v68_v13 = vld [vmem:[#allocation3 + $0x10] sm:$0xff] }
  0x14   :  { %303 = vmatpush.xpose.msk.msra.mxu1 %vm86_vm0, %v80_v1  ;;  %283 = vmatpush.xpose.msk.msra.mxu0 %vm86_vm0, %v80_v1  ;;  %v67_v14 = vld [vmem:[#allocation3 + $0x8] sm:$0xff]  ;;  %v66_v15 = vld [vmem:[#allocation3] sm:$0xff]  ;;  %v173_v32 = vld [vmem:[#allocation8] sm:$0xff] }
  0x15   :  { %v85_v16 = vld [vmem:[#allocation6 + $0x8] sm:$0xff]  ;;  %v84_v17 = vld [vmem:[#allocation6] sm:$0xff] }
  0x18   :  { %304 = vmatpush.xpose.msk.msra.mxu1 %vm86_vm0, %v79_v2  ;;  %284 = vmatpush.xpose.msk.msra.mxu0 %vm86_vm0, %v79_v2 }
  0x1c   :  { %305 = vmatpush.xpose.msk.msra.mxu1 %vm86_vm0, %v78_v3  ;;  %285 = vmatpush.xpose.msk.msra.mxu0 %vm86_vm0, %v78_v3 }
  0x20   :  { %306 = vmatpush.xpose.msk.msra.mxu1 %vm86_vm0, %v77_v4  ;;  %286 = vmatpush.xpose.msk.msra.mxu0 %vm86_vm0, %v77_v4 }
  0x24   :  { %307 = vmatpush.xpose.msk.msra.mxu1 %vm86_vm0, %v76_v5  ;;  %287 = vmatpush.xpose.msk.msra.mxu0 %vm86_vm0, %v76_v5 }
  0x28   :  { %308 = vmatpush.xpose.msk.msra.mxu1 %vm86_vm0, %v75_v6  ;;  %288 = vmatpush.xpose.msk.msra.mxu0 %vm86_vm0, %v75_v6 }
  0x2c   :  { %309 = vmatpush.xpose.msk.msra.mxu1 %vm86_vm0, %v74_v7  ;;  %289 = vmatpush.xpose.msk.msra.mxu0 %vm86_vm0, %v74_v7 }
  0x30   :  { %310 = vmatpush.xpose.msk.msra.mxu1 %vm86_vm0, %v73_v8  ;;  %290 = vmatpush.xpose.msk.msra.mxu0 %vm86_vm0, %v73_v8 }
  0x34   :  { %311 = vmatpush.xpose.msk.msra.mxu1 %vm86_vm0, %v72_v9  ;;  %291 = vmatpush.xpose.msk.msra.mxu0 %vm86_vm0, %v72_v9 }
  0x38   :  { %312 = vmatpush.xpose.msk.msra.mxu1 %vm86_vm0, %v71_v10  ;;  %292 = vmatpush.xpose.msk.msra.mxu0 %vm86_vm0, %v71_v10 }
  0x3c   :  { %313 = vmatpush.xpose.msk.msra.mxu1 %vm86_vm0, %v70_v11  ;;  %293 = vmatpush.xpose.msk.msra.mxu0 %vm86_vm0, %v70_v11 }
  0x40   :  { %314 = vmatpush.xpose.msk.msra.mxu1 %vm86_vm0, %v69_v12  ;;  %294 = vmatpush.xpose.msk.msra.mxu0 %vm86_vm0, %v69_v12 }
  0x44   :  { %315 = vmatpush.xpose.msk.msra.mxu1 %vm86_vm0, %v68_v13  ;;  %295 = vmatpush.xpose.msk.msra.mxu0 %vm86_vm0, %v68_v13 }
  0x48   :  { %316 = vmatpush.xpose.msk.msra.mxu1 %vm86_vm0, %v67_v14  ;;  %296 = vmatpush.xpose.msk.msra.mxu0 %vm86_vm0, %v67_v14 }
  0x4c   :  { %317 = vmatpush.xpose.msk.msra.mxu1 %vm86_vm0, %v66_v15  ;;  %297 = vmatpush.xpose.msk.msra.mxu0 %vm86_vm0, %v66_v15 }
  0x4f   :  { %299 = vmatmul.msk.f32.vlgmr.msra.gmra.mxu1 %vm86_vm0, %v85_v16  ;;  %298 = vmatmul.msk.f32.vlgmr.msra.gmra.mxu0 %vm86_vm0, %v84_v17 }
  0xcc   :  { %v161_v18 = vpop.f32.mrf.mxu1  ;;  %v158_v34 = vpop.f32.mrf.mxu0 }
  0xcd   :  { %v175_v19 = vand.u32 2147483647, %v161_v18  ;;  %v174_v30 = vmax.f32 %v161_v18, 0.0 }
  0xcf   :  { %v176_v20 = vsub.f32 0.0, %v175_v19 }
  0xd1   :  { %v177_v21 = vmul.f32 1.442695, %v176_v20 }
  0xd3   :  { %325 = vpow2.f32 %v177_v21 }
  0xd9   :  { %v326_v22 = vpop.eup %325 }
  0xda   :  { %v179_v23 = vadd.f32 1.0, %v326_v22  ;;  %v182_v24 = vmul.f32 -0.5, %v326_v22  ;;  %v185_v26 = vand.u32 2147483647, %v326_v22 }
  0xdc   :  { %327 = vlog2.f32 %v179_v23  ;;  %v183_v25 = vadd.f32 1.0, %v182_v24  ;;  %vm186_vm1 = vcmp.lt.f32.partialorder %v185_v26, 0.0004427343 }
  0xde   :  { %v184_v29 = vmul.f32 %v326_v22, %v183_v25 }
  0xe2   :  { %v328_v27 = vpop.eup %327 }
  0xe3   :  { %v181_v28 = vmul.f32 0.6931472, %v328_v27 }
  0xe5   :  { %v187_v31 = vsel %vm186_vm1, %v184_v29, %v181_v28 }
  0xe6   :  { %v188_v33 = vadd.f32 %v187_v31, %v174_v30 }
  0xe8   :  { %v189_v35 = vmul.f32 %v188_v33, %v173_v32 }
  0xea   :  { %v190_v36 = vadd.f32 %v189_v35, %v158_v34 }
  0xec   :  { %v193_v37 = vrot.slane %v190_v36, 4 }
  0xee   :  { %v194_v38 = vmax.f32 %v190_v36, %v193_v37 }
  0xf0   :  { %v195_v39 = vrot.slane %v194_v38, 2 }
  0xf2   :  { %v196_v41 = vmax.f32 %v194_v38, %v195_v39 }
  0xf4   :  { %v197_v42 = vrot.slane %v196_v41, 1 }
  0xf6   :  { %v198_v44 = vmax.f32 %v196_v41, %v197_v42 }
  0xf8   :  { %vm199_vm2 = vcmp.eq.f32.partialorder %v190_v36, %v198_v44  ;;  %v213_v59 = vsub.f32 %v198_v44, %v198_v44 }
  0xf9   :  { %v200_v45 = vsel %vm199_vm2, %v192_v43, 8 }
  0xfa   :  { %v201_v46 = vrot.slane %v200_v45, 4  ;;  %v214_v62 = vmul.f32 1.442695, %v213_v59 }
  0xfc   :  { %vm202_vm3 = vcmp.lt.s32.totalorder %v200_v45, %v201_v46  ;;  %329 = vpow2.f32 %v214_v62 }
  0xfd   :  { %v203_v47 = vsel %vm202_vm3, %v200_v45, %v201_v46 }
  0xfe   :  { %v204_v48 = vrot.slane %v203_v47, 2 }
 0x100   :  { %vm205_vm4 = vcmp.lt.s32.totalorder %v203_v47, %v204_v48 }
 0x101   :  { %v206_v49 = vsel %vm205_vm4, %v203_v47, %v204_v48 }
 0x102   :  { %v207_v50 = vrot.slane %v206_v49, 1  ;;  %v330_v5 = vpop.eup %329 }
 0x104   :  { %vm208_vm5 = vcmp.lt.s32.totalorder %v206_v49, %v207_v50 }
 0x105   :  { %v209_v51 = vsel %vm208_vm5, %v206_v49, %v207_v50 }
 0x106   :  { %vm210_vm6 = vcmp.eq.s32.totalorder %v192_v43, %v209_v51 }
 0x107   :  { %v300_v53 = vsel %vm210_vm6, 1.0, %v442_v52 }
 0x108   :  { %vm219_vm7 = vcmp.gt.f32.partialorder %v300_v53, 0.0  ;;  %v216_v19 = vmul.f32 %v330_v5, %v300_v53 }
 0x109   :  { %v220_v54 = vsel %vm219_vm7, -inf, %v190_v36 }
 0x10a   :  { %v221_v55 = vrot.slane %v220_v54, 4 }
 0x10c   :  { %v222_v56 = vmax.f32 %v220_v54, %v221_v55 }
 0x10e   :  { %v223_v57 = vrot.slane %v222_v56, 2 }
 0x110   :  { %v224_v58 = vmax.f32 %v222_v56, %v223_v57 }
 0x112   :  { %v225_v60 = vrot.slane %v224_v58, 1 }
 0x114   :  { %v226_v61 = vmax.f32 %v224_v58, %v225_v60 }
 0x116   :  { %vm227_vm8 = vcmp.eq.f32.partialorder %v220_v54, %v226_v61  ;;  %v241_v63 = vsub.f32 %v226_v61, %v198_v44 }
 0x117   :  { %v228_v0 = vsel %vm227_vm8, %v192_v43, 8 }
 0x118   :  { %v229_v1 = vrot.slane %v228_v0, 4  ;;  %v242_v2 = vmul.f32 1.442695, %v241_v63 }
 0x11a   :  { %vm230_vm9 = vcmp.lt.s32.totalorder %v228_v0, %v229_v1  ;;  %331 = vpow2.f32 %v242_v2 }
 0x11b   :  { %v231_v3 = vsel %vm230_vm9, %v228_v0, %v229_v1 }
 0x11c   :  { %v232_v4 = vrot.slane %v231_v3, 2 }
 0x11e   :  { %vm233_vm10 = vcmp.lt.s32.totalorder %v231_v3, %v232_v4 }
 0x11f   :  { %v234_v6 = vsel %vm233_vm10, %v231_v3, %v232_v4 }
 0x120   :  { %v332_v7 = vpop.eup %331  ;;  %v235_v8 = vrot.slane %v234_v6, 1 }
 0x121   :  { %v246_v9 = vadd.f32 %v332_v7, %v330_v5 }
 0x122   :  { %vm236_vm11 = vcmp.lt.s32.totalorder %v234_v6, %v235_v8 }
 0x123   :  { %333 = vrcp.f32 %v246_v9  ;;  %v237_v10 = vsel %vm236_vm11, %v234_v6, %v235_v8  ;;  %v258_v15 = vand.u32 2147483648, %v246_v9  ;;  %v256_v18 = vand.u32 2147483647, %v246_v9 }
 0x124   :  { %vm238_vm12 = vcmp.eq.s32.totalorder %v192_v43, %v237_v10  ;;  %vm252_vm14 = vweird.f32 %v246_v9 }
 0x125   :  { %v301_v13 = vsel %vm238_vm12, 1.0, %v442_v52  ;;  %v259_v21 = vor.u32 1.1754944e-38, %v258_v15  ;;  %vm257_vm0 = vcmp.eq.f32.partialorder %v256_v18, 8.507059e+37 }
 0x126   :  { %v244_v16 = vmul.f32 %v332_v7, %v301_v13 }
 0x128   :  { %v245_v22 = vadd.f32 %v244_v16, %v216_v19 }
 0x129   :  { %v334_v11 = vpop.eup %333 }
 0x12a   :  { %v248_v12 = vmul.f32 %v334_v11, %v246_v9  ;;  %vm253_vm13 = vweird.f32 %v334_v11 }
 0x12b   :  { %vm254_vm15 = vmor %vm252_vm14, %vm253_vm13 }
 0x12c   :  { %v249_v14 = vsub.f32 1.0, %v248_v12 }
 0x12e   :  { %v250_v17 = vmul.f32 %v334_v11, %v249_v14 }
 0x130   :  { %v251_v20 = vadd.f32 %v334_v11, %v250_v17 }
 0x132   :  { %v255_v23 = vsel %vm254_vm15, %v334_v11, %v251_v20 }
 0x133   :  { %v260_v24 = vsel %vm257_vm0, %v259_v21, %v255_v23 }
 0x134   :  { %v262_v25 = vmul.f32 %v260_v24, %v245_v22 }
 0x136   :  { %263 = vst [vmem:[#allocation9] sm:$0xff] %v262_v25 }
 0x137   :  { %274 = dma.vmem_to_hbm [thread:$0]  %s270_s2, 128, %s272_s30, [#allocation5]  }
 0x138   :  { %435 = dma.done.wait [#allocation5], 128  }
 0x139   :  { %436 = vsyncadd [#allocation5], 4294967168 }
 0x13a   :  { %279 = vsyncpa [#allocation4], 1 }
 0x13b   :  { %280 = vsyncpa [#allocation7], 1 }
 0x13c   :  { %281 = vsyncpa [#allocation5], 1 }

</bundles_post_ra>
